<compile_context>
chip_gen: v7x
topology: tpu7x:2x2x1
jax: 0.10.0
libtpu: 0.0.40
codegen_flags: <defaults>
</compile_context>

<pallas_src>
import jax
import jax.numpy as jnp
from jax.experimental import pallas as pl
from jax.experimental.pallas import tpu as pltpu

IN_DIM = 16
HIDDEN = 128
OUT_DIM = 60
OUT_PAD = 128          # lane-dense padded output width (unmasked vst)
MIN_TILE_B = 16        # bf16 packs 2 rows/sublane -> keep batch tiles %16 (v5e-safe)
MAX_TILE_B = 2048      # bf16 out block is 512 KB x2 buffers at 2048 rows: trivially
                       # within VMEM on every generation, 8x less step overhead vs 256


def mlp_kernel(x_ref, w1_ref, b1_ref, w2_ref, b2_ref, w3_ref, b3_ref,
               w4_ref, b4_ref, o_ref):
    # x / weights arrive pre-cast to bf16.  Every matmul accumulates in f32 on
    # the MXU; bias-add / ReLU run on the f32 accumulator (v5e VPU/EUP have no
    # bf16 elementwise); activations downcast to bf16 only to feed the next MXU.
    h = jnp.dot(x_ref[...], w1_ref[...], preferred_element_type=jnp.float32)
    h = jnp.maximum(h + b1_ref[...], 0.0)
    h = jnp.dot(h.astype(jnp.bfloat16), w2_ref[...], preferred_element_type=jnp.float32)
    h = jnp.maximum(h + b2_ref[...], 0.0)
    h = jnp.dot(h.astype(jnp.bfloat16), w3_ref[...], preferred_element_type=jnp.float32)
    h = jnp.maximum(h + b3_ref[...], 0.0)
    h = jnp.dot(h.astype(jnp.bfloat16), w4_ref[...], preferred_element_type=jnp.float32)
    # Lane-dense (tile_b, 128) bf16 store; the real 60 logits are sliced by the consumer.
    o_ref[...] = (h + b4_ref[...]).astype(o_ref.dtype)


def _round_up(n, m):
    return ((n + m - 1) // m) * m


def _pick_tiling(batch):
    """Adaptive batch tile: no huge padding for small batches, big tiles for big
    batches, and >=2 grid steps once the batch is large enough so v7x can shard
    tiles across both TensorCores."""
    bp = _round_up(max(batch, 1), MIN_TILE_B)
    tile = min(MAX_TILE_B, bp)
    if bp >= 1024:  # big enough that splitting doesn't drop below per-step overhead
        tile = min(tile, _round_up(pl.cdiv(bp, 2), MIN_TILE_B))
    n_tiles = pl.cdiv(bp, tile)
    return tile, n_tiles, n_tiles * tile


def mlp_forward(x, params, return_padded=False):
    """params: w1..w4 shaped (in, out), b1..b4 shaped (1, out), all f32.

    Returns (B, 60) bf16 logits (f32 accumulation inside the kernel).  With
    return_padded=True the raw (Bp, 128) kernel output is returned so the
    consumer can slice lazily and skip the extra output-slice HBM pass.
    """
    B = x.shape[0]
    tile_b, n_tiles, Bp = _pick_tiling(B)

    # Single fused pad+cast pass over x (bf16 halves the x DMA bytes).
    x_p = x if Bp == B else jnp.pad(x, ((0, Bp - B), (0, 0)))
    x_p = x_p.astype(jnp.bfloat16)

    # bf16 weights stay VMEM-resident across all grid steps; layer-4 weight and
    # bias zero-padded 60 -> 128 so the output store is lane-dense.
    w1 = params["w1"].astype(jnp.bfloat16)
    w2 = params["w2"].astype(jnp.bfloat16)
    w3 = params["w3"].astype(jnp.bfloat16)
    w4 = jnp.pad(params["w4"], ((0, 0), (0, OUT_PAD - OUT_DIM))).astype(jnp.bfloat16)
    b1, b2, b3 = params["b1"], params["b2"], params["b3"]
    b4 = jnp.pad(params["b4"], ((0, 0), (0, OUT_PAD - OUT_DIM)))

    flops = 2 * Bp * (IN_DIM * HIDDEN + 2 * HIDDEN * HIDDEN + HIDDEN * OUT_PAD)
    bytes_accessed = (int(x_p.size) * 2 + Bp * OUT_PAD * 2
                      + sum(int(a.size) * a.dtype.itemsize
                            for a in (w1, w2, w3, w4, b1, b2, b3, b4)))

    def resident(shape):  # same block index every grid step -> stays in VMEM
        return pl.BlockSpec(shape, lambda i: (0, 0))

    out_p = pl.pallas_call(
        mlp_kernel,
        out_shape=jax.ShapeDtypeStruct((Bp, OUT_PAD), jnp.bfloat16),
        grid=(n_tiles,),
        in_specs=[
            pl.BlockSpec((tile_b, IN_DIM), lambda i: (i, 0)),     # x: tiled over batch
            resident((IN_DIM, HIDDEN)),  resident((1, HIDDEN)),    # w1, b1
            resident((HIDDEN, HIDDEN)),  resident((1, HIDDEN)),    # w2, b2
            resident((HIDDEN, HIDDEN)),  resident((1, HIDDEN)),    # w3, b3
            resident((HIDDEN, OUT_PAD)), resident((1, OUT_PAD)),   # w4, b4 (padded)
        ],
        out_specs=pl.BlockSpec((tile_b, OUT_PAD), lambda i: (i, 0)),
        compiler_params=pltpu.CompilerParams(
            dimension_semantics=("parallel",)),  # v7x: shard batch tiles over 2 TCs
        cost_estimate=pl.CostEstimate(
            flops=flops, transcendentals=0, bytes_accessed=bytes_accessed),
    )(x_p, w1, b1, w2, b2, w3, b3, w4, b4)

    if return_padded:
        return out_p
    return out_p[:B, :OUT_DIM]


def init_params(key):
    """Deterministic init matching nn.Linear shapes (weights stored as (in, out))."""
    dims = [(IN_DIM, HIDDEN), (HIDDEN, HIDDEN), (HIDDEN, HIDDEN), (HIDDEN, OUT_DIM)]
    params = {}
    for i, (fan_in, fan_out) in enumerate(dims, start=1):
        key, kw, kb = jax.random.split(key, 3)
        bound = 1.0 / jnp.sqrt(fan_in)
        params[f"w{i}"] = jax.random.uniform(
            kw, (fan_in, fan_out), jnp.float32, minval=-bound, maxval=bound)
        params[f"b{i}"] = jax.random.uniform(
            kb, (1, fan_out), jnp.float32, minval=-bound, maxval=bound)
    return params


def reference_forward(x, params):
    h = x
    for i in range(1, 4):
        h = jnp.maximum(h @ params[f"w{i}"] + params[f"b{i}"], 0.0)
    return h @ params["w4"] + params["b4"]


if __name__ == "__main__":
    key = jax.random.PRNGKey(0)
    key, kx = jax.random.split(key)
    batch = 8
    x = jax.random.normal(kx, (batch, IN_DIM), jnp.float32)
    params = init_params(key)

    out = mlp_forward(x, params)
    jax.block_until_ready(out)

    ref = reference_forward(x, params)
    assert out.shape == (batch, OUT_DIM), out.shape
    # bf16 weights/activations/output with f32 accumulation -> loose tolerance vs f32 ref.
    err = jnp.max(jnp.abs(out.astype(jnp.float32) - ref))
    assert err < 1e-1, f"mismatch vs reference, max abs err {err}"
    print("KERNEL_OK")
</pallas_src>

<mosaic_0001>
module attributes {stable_mosaic.version = 11 : i64} {
  func.func @mlp_kernel(%arg0: i32, %arg1: memref<16x16xbf16, #tpu.memory_space<vmem>>, %arg2: memref<16x128xbf16, #tpu.memory_space<vmem>>, %arg3: memref<1x128xf32, #tpu.memory_space<vmem>>, %arg4: memref<128x128xbf16, #tpu.memory_space<vmem>>, %arg5: memref<1x128xf32, #tpu.memory_space<vmem>>, %arg6: memref<128x128xbf16, #tpu.memory_space<vmem>>, %arg7: memref<1x128xf32, #tpu.memory_space<vmem>>, %arg8: memref<128x128xbf16, #tpu.memory_space<vmem>>, %arg9: memref<1x128xf32, #tpu.memory_space<vmem>>, %arg10: memref<16x128xbf16, #tpu.memory_space<vmem>>) attributes {dimension_semantics = [#tpu.dimension_semantics<parallel>], iteration_bounds = array<i64: 1>, scalar_prefetch = 0 : i64, scratch_operands = 0 : i64, tpu.core_type = #tpu.core_type<tc>, window_params = [{transform_indices = @transform_0, window_bounds = array<i64: 16, 16>}, {pipeline_mode = #tpu.pipeline_mode<synchronous>, transform_indices = @transform_1, window_bounds = array<i64: 16, 128>}, {pipeline_mode = #tpu.pipeline_mode<synchronous>, transform_indices = @transform_2, window_bounds = array<i64: 1, 128>}, {pipeline_mode = #tpu.pipeline_mode<synchronous>, transform_indices = @transform_3, window_bounds = array<i64: 128, 128>}, {pipeline_mode = #tpu.pipeline_mode<synchronous>, transform_indices = @transform_4, window_bounds = array<i64: 1, 128>}, {pipeline_mode = #tpu.pipeline_mode<synchronous>, transform_indices = @transform_5, window_bounds = array<i64: 128, 128>}, {pipeline_mode = #tpu.pipeline_mode<synchronous>, transform_indices = @transform_6, window_bounds = array<i64: 1, 128>}, {pipeline_mode = #tpu.pipeline_mode<synchronous>, transform_indices = @transform_7, window_bounds = array<i64: 128, 128>}, {pipeline_mode = #tpu.pipeline_mode<synchronous>, transform_indices = @transform_8, window_bounds = array<i64: 1, 128>}, {transform_indices = @transform_9, window_bounds = array<i64: 16, 128>}]} {
    %c0 = arith.constant 0 : index
    %c0_0 = arith.constant 0 : index
    %0 = vector.load %arg1[%c0, %c0_0] : memref<16x16xbf16, #tpu.memory_space<vmem>>, vector<16x16xbf16>
    %c0_1 = arith.constant 0 : index
    %c0_2 = arith.constant 0 : index
    %1 = vector.load %arg2[%c0_1, %c0_2] : memref<16x128xbf16, #tpu.memory_space<vmem>>, vector<16x128xbf16>
    %cst = arith.constant dense<0.000000e+00> : vector<16x128xf32>
    %2 = tpu.matmul %0, %1, %cst {dimension_numbers = #tpu.dot_dimension_numbers<[1], [0], [0], [1], [0, 0, 1, 1], [], []>} : vector<16x16xbf16>, vector<16x128xbf16>, vector<16x128xf32> -> vector<16x128xf32>
    %c0_3 = arith.constant 0 : index
    %c0_4 = arith.constant 0 : index
    %3 = vector.load %arg3[%c0_3, %c0_4] : memref<1x128xf32, #tpu.memory_space<vmem>>, vector<1x128xf32>
    %4 = vector.broadcast %3 : vector<1x128xf32> to vector<16x128xf32>
    %5 = arith.addf %2, %4 : vector<16x128xf32>
    %cst_5 = arith.constant 0.000000e+00 : f32
    %6 = vector.broadcast %cst_5 : f32 to vector<16x128xf32>
    %7 = arith.maximumf %5, %6 : vector<16x128xf32>
    %8 = arith.truncf %7 : vector<16x128xf32> to vector<16x128xbf16>
    %c0_6 = arith.constant 0 : index
    %c0_7 = arith.constant 0 : index
    %9 = vector.load %arg4[%c0_6, %c0_7] : memref<128x128xbf16, #tpu.memory_space<vmem>>, vector<128x128xbf16>
    %cst_8 = arith.constant dense<0.000000e+00> : vector<16x128xf32>
    %10 = tpu.matmul %8, %9, %cst_8 {dimension_numbers = #tpu.dot_dimension_numbers<[1], [0], [0], [1], [0, 0, 1, 1], [], []>} : vector<16x128xbf16>, vector<128x128xbf16>, vector<16x128xf32> -> vector<16x128xf32>
    %c0_9 = arith.constant 0 : index
    %c0_10 = arith.constant 0 : index
    %11 = vector.load %arg5[%c0_9, %c0_10] : memref<1x128xf32, #tpu.memory_space<vmem>>, vector<1x128xf32>
    %12 = vector.broadcast %11 : vector<1x128xf32> to vector<16x128xf32>
    %13 = arith.addf %10, %12 : vector<16x128xf32>
    %cst_11 = arith.constant 0.000000e+00 : f32
    %14 = vector.broadcast %cst_11 : f32 to vector<16x128xf32>
    %15 = arith.maximumf %13, %14 : vector<16x128xf32>
    %16 = arith.truncf %15 : vector<16x128xf32> to vector<16x128xbf16>
    %c0_12 = arith.constant 0 : index
    %c0_13 = arith.constant 0 : index
    %17 = vector.load %arg6[%c0_12, %c0_13] : memref<128x128xbf16, #tpu.memory_space<vmem>>, vector<128x128xbf16>
    %cst_14 = arith.constant dense<0.000000e+00> : vector<16x128xf32>
    %18 = tpu.matmul %16, %17, %cst_14 {dimension_numbers = #tpu.dot_dimension_numbers<[1], [0], [0], [1], [0, 0, 1, 1], [], []>} : vector<16x128xbf16>, vector<128x128xbf16>, vector<16x128xf32> -> vector<16x128xf32>
    %c0_15 = arith.constant 0 : index
    %c0_16 = arith.constant 0 : index
    %19 = vector.load %arg7[%c0_15, %c0_16] : memref<1x128xf32, #tpu.memory_space<vmem>>, vector<1x128xf32>
    %20 = vector.broadcast %19 : vector<1x128xf32> to vector<16x128xf32>
    %21 = arith.addf %18, %20 : vector<16x128xf32>
    %cst_17 = arith.constant 0.000000e+00 : f32
    %22 = vector.broadcast %cst_17 : f32 to vector<16x128xf32>
    %23 = arith.maximumf %21, %22 : vector<16x128xf32>
    %24 = arith.truncf %23 : vector<16x128xf32> to vector<16x128xbf16>
    %c0_18 = arith.constant 0 : index
    %c0_19 = arith.constant 0 : index
    %25 = vector.load %arg8[%c0_18, %c0_19] : memref<128x128xbf16, #tpu.memory_space<vmem>>, vector<128x128xbf16>
    %cst_20 = arith.constant dense<0.000000e+00> : vector<16x128xf32>
    %26 = tpu.matmul %24, %25, %cst_20 {dimension_numbers = #tpu.dot_dimension_numbers<[1], [0], [0], [1], [0, 0, 1, 1], [], []>} : vector<16x128xbf16>, vector<128x128xbf16>, vector<16x128xf32> -> vector<16x128xf32>
    %c0_21 = arith.constant 0 : index
    %c0_22 = arith.constant 0 : index
    %27 = vector.load %arg9[%c0_21, %c0_22] : memref<1x128xf32, #tpu.memory_space<vmem>>, vector<1x128xf32>
    %28 = vector.broadcast %27 : vector<1x128xf32> to vector<16x128xf32>
    %29 = arith.addf %26, %28 : vector<16x128xf32>
    %30 = arith.truncf %29 : vector<16x128xf32> to vector<16x128xbf16>
    %c0_23 = arith.constant 0 : index
    %c0_24 = arith.constant 0 : index
    %31 = vector.load %arg10[%c0_23, %c0_24] : memref<16x128xbf16, #tpu.memory_space<vmem>>, vector<16x128xbf16>
    tpu.vector_store %arg10[%c0_23, %c0_24], %30 {strides = array<i32>} : memref<16x128xbf16, #tpu.memory_space<vmem>>, vector<16x128xbf16>,
    return
  }
  func.func @transform_0(%arg0: i32) -> (i32, i32) {
    %c0_i32 = arith.constant 0 : i32
    %c0_i32_0 = arith.constant 0 : i32
    return %arg0, %c0_i32 : i32, i32
  }
  func.func @transform_1(%arg0: i32) -> (i32, i32) {
    %c0_i32 = arith.constant 0 : i32
    %c0_i32_0 = arith.constant 0 : i32
    %c0_i32_1 = arith.constant 0 : i32
    return %c0_i32, %c0_i32_0 : i32, i32
  }
  func.func @transform_2(%arg0: i32) -> (i32, i32) {
    %c0_i32 = arith.constant 0 : i32
    %c0_i32_0 = arith.constant 0 : i32
    %c0_i32_1 = arith.constant 0 : i32
    return %c0_i32, %c0_i32_0 : i32, i32
  }
  func.func @transform_3(%arg0: i32) -> (i32, i32) {
    %c0_i32 = arith.constant 0 : i32
    %c0_i32_0 = arith.constant 0 : i32
    %c0_i32_1 = arith.constant 0 : i32
    return %c0_i32, %c0_i32_0 : i32, i32
  }
  func.func @transform_4(%arg0: i32) -> (i32, i32) {
    %c0_i32 = arith.constant 0 : i32
    %c0_i32_0 = arith.constant 0 : i32
    %c0_i32_1 = arith.constant 0 : i32
    return %c0_i32, %c0_i32_0 : i32, i32
  }
  func.func @transform_5(%arg0: i32) -> (i32, i32) {
    %c0_i32 = arith.constant 0 : i32
    %c0_i32_0 = arith.constant 0 : i32
    %c0_i32_1 = arith.constant 0 : i32
    return %c0_i32, %c0_i32_0 : i32, i32
  }
  func.func @transform_6(%arg0: i32) -> (i32, i32) {
    %c0_i32 = arith.constant 0 : i32
    %c0_i32_0 = arith.constant 0 : i32
    %c0_i32_1 = arith.constant 0 : i32
    return %c0_i32, %c0_i32_0 : i32, i32
  }
  func.func @transform_7(%arg0: i32) -> (i32, i32) {
    %c0_i32 = arith.constant 0 : i32
    %c0_i32_0 = arith.constant 0 : i32
    %c0_i32_1 = arith.constant 0 : i32
    return %c0_i32, %c0_i32_0 : i32, i32
  }
  func.func @transform_8(%arg0: i32) -> (i32, i32) {
    %c0_i32 = arith.constant 0 : i32
    %c0_i32_0 = arith.constant 0 : i32
    %c0_i32_1 = arith.constant 0 : i32
    return %c0_i32, %c0_i32_0 : i32, i32
  }
  func.func @transform_9(%arg0: i32) -> (i32, i32) {
    %c0_i32 = arith.constant 0 : i32
    %c0_i32_0 = arith.constant 0 : i32
    return %arg0, %c0_i32 : i32, i32
  }
}

</mosaic_0001>

<bundles_post_ra>
// kernel: tpu_custom_call.1
= control target key start
LH: loop header
LB: loop body
LE: loop exit
PB: predicated region body
PF: predicated region fallthrough
CT: control target
= control target key end

     0   :  { %14 = vsyncpa [#allocation3], 0  ;;  %s1063_s0 = inlined_call_operand.hbm [shape: bf16[16,16], index: 0, kind: input, shape index: {}]   ;;  %s1064_s1 = inlined_call_operand.hbm [shape: bf16[16,128], index: 1, kind: input, shape index: {}]   ;;  %s1065_s2 = inlined_call_operand.vmem [shape: f32[1,128], index: 2, kind: input, shape index: {}]   ;;  %s1066_s3 = inlined_call_operand.hbm [shape: bf16[128,128], index: 3, kind: input, shape index: {}]   ;;  %s1067_s4 = inlined_call_operand.vmem [shape: f32[1,128], index: 4, kind: input, shape index: {}]   ;;  %s1068_s5 = inlined_call_operand.hbm [shape: bf16[128,128], index: 5, kind: input, shape index: {}]   ;;  %s1069_s6 = inlined_call_operand.vmem [shape: f32[1,128], index: 6, kind: input, shape index: {}]   ;;  %s1070_s7 = inlined_call_operand.hbm [shape: bf16[128,128], index: 7, kind: input, shape index: {}]   ;;  %s1071_s8 = inlined_call_operand.vmem [shape: f32[1,128], index: 8, kind: input, shape index: {}]   ;;  %s1072_s9 = inlined_call_operand.hbm [shape: bf16[16,128], index: 9, kind: output, shape index: {}]  }
   0x1   :  { %15 = vsyncpa [#allocation6], 0 }
   0x2   :  { %16 = vsyncpa [#allocation9], 0 }
   0x3   :  { %17 = vsyncpa [#allocation4], 0  ;;  %s854_s30 = smov [#allocation5]   ;;  %s855_s11 = smov [#allocation8]  }
   0x4   :  { %s35_s10 = sshll.u32 %s854_s30, 4  ;;  %s63_s12 = sshll.u32 %s855_s11, 4  ;;  %s36_s10 = int_to_ptr.vmem [resolvable:$true] %s35_s10  ;;  %s914_s12 = int_to_ptr.vmem [resolvable:$true] %s63_s12 }
   0x5   :  { %s714_s15 = scalar_lea.hbm %s1064_s1, 128 }
   0x6   :  { %p715_p0 = scmp.ne.s32.totalorder %s1064_s1, %s714_s15  ;;  %p718_p1 = scmp.lt.u32.totalorder %s714_s15, %s1064_s1 }
   0x8   :  { %p720_p2 = pnand %p718_p1, %p715_p0 }
   0xa   :  { %723 = shalt.err (!%p720_p2)
}
   0xb   :  { %s724_s20 = scalar_lea.vmem %s36_s10, 128  ;;  %p729_p4 = scmp.lt.s32.totalorder %s36_s10, %s36_s10 }
   0xc   :  { %p725_p3 = scmp.ne.s32.totalorder %s36_s10, %s724_s20  ;;  %p730_p5 = scmp.lt.s32.totalorder %s724_s20, %s724_s20 }
   0xe   :  { %p731_p6 = por %p730_p5, %p729_p4 }
  0x10   :  { %p732_p7 = pnand %p731_p6, %p725_p3 }
  0x12   :  { %735 = shalt.err (!%p732_p7)
}
  0x13   :  { %s856_s21 = smov 64   ;;  %s857_s22 = smov 4  }
  0x14   :  { %41 = dma.hbm_to_vmem [thread:$0]  %s1064_s1, 128, %s36_s10, [#allocation6], %s856_s21, %s856_s21, %s857_s22  }
  0x15   :  { %s736_s27 = scalar_lea.hbm %s1068_s5, 1024 }
  0x16   :  { %p737_p8 = scmp.ne.s32.totalorder %s1068_s5, %s736_s27  ;;  %p740_p9 = scmp.lt.u32.totalorder %s736_s27, %s1068_s5 }
  0x18   :  { %p742_p10 = pnand %p740_p9, %p737_p8 }
  0x1a   :  { %745 = shalt.err (!%p742_p10)
}
  0x1b   :  { %s746_s13 = scalar_lea.vmem %s914_s12, 1024  ;;  %p751_p12 = scmp.lt.s32.totalorder %s914_s12, %s914_s12 }
  0x1c   :  { %p747_p11 = scmp.ne.s32.totalorder %s914_s12, %s746_s13  ;;  %p752_p13 = scmp.lt.s32.totalorder %s746_s13, %s746_s13 }
  0x1e   :  { %p753_p0 = por %p752_p13, %p751_p12 }
  0x20   :  { %p754_p1 = pnand %p753_p0, %p747_p11 }
  0x22   :  { %757 = shalt.err (!%p754_p1)
}
  0x23   :  { %69 = dma.hbm_to_vmem [thread:$0]  %s1068_s5, 1024, %s914_s12, [#allocation9], %s856_s21, %s856_s21, %s857_s22  }
  0x24   :  { %s858_s14 = smov [#allocation2]   ;;  %s859_s16 = smov [#allocation7]  }
  0x25   :  { %s23_s15 = sshll.u32 %s858_s14, 4  ;;  %s49_s17 = sshll.u32 %s859_s16, 4  ;;  %s24_s15 = int_to_ptr.vmem [resolvable:$true] %s23_s15  ;;  %s951_s17 = int_to_ptr.vmem [resolvable:$true] %s49_s17 }
  0x26   :  { %s758_s20 = scalar_lea.hbm %s1063_s0, 128 }
  0x27   :  { %p759_p2 = scmp.ne.s32.totalorder %s1063_s0, %s758_s20  ;;  %p762_p3 = scmp.lt.u32.totalorder %s758_s20, %s1063_s0 }
  0x29   :  { %p764_p4 = pnand %p762_p3, %p759_p2 }
  0x2b   :  { %767 = shalt.err (!%p764_p4)
}
  0x2c   :  { %s768_s5 = scalar_lea.vmem %s24_s15, 128  ;;  %p773_p6 = scmp.lt.s32.totalorder %s24_s15, %s24_s15 }
  0x2d   :  { %p769_p5 = scmp.ne.s32.totalorder %s24_s15, %s768_s5  ;;  %p774_p7 = scmp.lt.s32.totalorder %s768_s5, %s768_s5 }
  0x2f   :  { %p775_p8 = por %p774_p7, %p773_p6 }
  0x31   :  { %p776_p9 = pnand %p775_p8, %p769_p5 }
  0x33   :  { %779 = shalt.err (!%p776_p9)
}
  0x34   :  { %29 = dma.hbm_to_vmem [thread:$0]  %s1063_s0, 128, %s24_s15, [#allocation3], %s856_s21, %s856_s21, %s857_s22  }
  0x35   :  { %s780_s30 = scalar_lea.hbm %s1066_s3, 1024 }
  0x36   :  { %p781_p10 = scmp.ne.s32.totalorder %s1066_s3, %s780_s30  ;;  %p784_p11 = scmp.lt.u32.totalorder %s780_s30, %s1066_s3 }
  0x38   :  { %p786_p12 = pnand %p784_p11, %p781_p10 }
  0x3a   :  { %789 = shalt.err (!%p786_p12)
}
  0x3b   :  { %s790_s14 = scalar_lea.vmem %s951_s17, 1024  ;;  %p795_p0 = scmp.lt.s32.totalorder %s951_s17, %s951_s17 }
  0x3c   :  { %p791_p13 = scmp.ne.s32.totalorder %s951_s17, %s790_s14  ;;  %p796_p1 = scmp.lt.s32.totalorder %s790_s14, %s790_s14 }
  0x3e   :  { %p797_p2 = por %p796_p1, %p795_p0 }
  0x40   :  { %p798_p3 = pnand %p797_p2, %p791_p13 }
  0x42   :  { %801 = shalt.err (!%p798_p3)
}
  0x43   :  { %55 = dma.hbm_to_vmem [thread:$0]  %s1066_s3, 1024, %s951_s17, [#allocation6], %s856_s21, %s856_s21, %s857_s22  }
  0x44   :  { %s860_s16 = smov [#allocation10]   ;;  %s802_s23 = scalar_lea.hbm %s1070_s7, 1024 }
  0x45   :  { %s77_s18 = sshll.u32 %s860_s16, 4  ;;  %p803_p4 = scmp.ne.s32.totalorder %s1070_s7, %s802_s23  ;;  %s78_s18 = int_to_ptr.vmem [resolvable:$true] %s77_s18 }
  0x46   :  { %p806_p5 = scmp.lt.u32.totalorder %s802_s23, %s1070_s7 }
  0x48   :  { %p808_p6 = pnand %p806_p5, %p803_p4 }
  0x4a   :  { %811 = shalt.err (!%p808_p6)
}
  0x4b   :  { %s812_s12 = scalar_lea.vmem %s78_s18, 1024  ;;  %p817_p8 = scmp.lt.s32.totalorder %s78_s18, %s78_s18 }
  0x4c   :  { %p813_p7 = scmp.ne.s32.totalorder %s78_s18, %s812_s12  ;;  %p818_p9 = scmp.lt.s32.totalorder %s812_s12, %s812_s12 }
  0x4e   :  { %p819_p10 = por %p818_p9, %p817_p8 }
  0x50   :  { %p820_p11 = pnand %p819_p10, %p813_p7 }
  0x52   :  { %823 = shalt.err (!%p820_p11)
}
  0x53   :  { %83 = dma.hbm_to_vmem [thread:$0]  %s1070_s7, 1024, %s78_s18, [#allocation9], %s856_s21, %s856_s21, %s857_s22  }
  0x54   :  { %846 = dma.done.wait [#allocation3], 128  }
  0x55   :  { %847 = vsyncadd [#allocation3], 4294967168 }
  0x56   :  { %848 = dma.done.wait [#allocation6], 1152  }
  0x57   :  { %849 = vsyncadd [#allocation6], 4294966144 }
  0x58   :  { %850 = dma.done.wait [#allocation9], 2048  }
  0x59   :  { %851 = vsyncadd [#allocation9], 4294965248  ;;  %v861_v0 = vmov 0.0   ;;  %vm862_vm0 = vmmov 0   ;;  %v688_v1 = vld [vmem:[#allocation5] sm:$0xff]   ;;  %v689_v2 = vld [vmem:[#allocation2] sm:$0xff]  }
  0x5a   :  { %612 = vmatprep.subr.bf16.mxu0 %v861_v0  ;;  %614 = vmatprep.mubr.msk.bf16.mxu0 %vm862_vm0, %v861_v0  ;;  %vm124_vm1 = vcmask 130048   ;;  %v690_v3 = vld [vmem:[#allocation7] sm:$0xff]   ;;  %v691_v4 = vld [vmem:[#allocation7 + $0x8] sm:$0xff]   ;;  %v692_v5 = vld [vmem:[#allocation7 + $0x10] sm:$0xff]   ;;  %s863_s13 = smov [#allocation11]  }
  0x5b   :  { %618 = vmatprep.subr.bf16.mxu1 %v861_v0  ;;  %634 = vmatprep.mubr.msk.bf16.mxu1 %vm862_vm0, %v861_v0  ;;  %v693_v6 = vld [vmem:[#allocation7 + $0x18] sm:$0xff]   ;;  %v694_v7 = vld [vmem:[#allocation7 + $0x20] sm:$0xff]   ;;  %v695_v8 = vld [vmem:[#allocation7 + $0x28] sm:$0xff]   ;;  %s529_s1 = sshll.u32 %s863_s13, 4  ;;  %s530_s1 = int_to_ptr.vmem [resolvable:$true] %s529_s1 }
  0x5c   :  { %613 = vmatpush3.bf16.msra.mxu0 %v688_v1  ;;  %619 = vmatpush3.bf16.msra.mxu1 %v690_v3  ;;  %v696_v9 = vld [vmem:[#allocation7 + $0x30] sm:$0xff]   ;;  %v697_v10 = vld [vmem:[#allocation7 + $0x38] sm:$0xff]   ;;  %v698_v11 = vld [vmem:[#allocation8] sm:$0xff]   ;;  %p829_p13 = scmp.lt.s32.totalorder %s530_s1, %s530_s1 }
  0x5d   :  { %638 = vmatprep.subr.bf16.mxu0 %v861_v0  ;;  %620 = vmatprep.subr.bf16.mxu1 %v861_v0  ;;  %v699_v12 = vld [vmem:[#allocation8 + $0x8] sm:$0xff]   ;;  %v700_v13 = vld [vmem:[#allocation8 + $0x10] sm:$0xff]   ;;  %v701_v14 = vld [vmem:[#allocation8 + $0x18] sm:$0xff]  }
  0x5e   :  { %v702_v15 = vld [vmem:[#allocation8 + $0x20] sm:$0xff]   ;;  %v703_v16 = vld [vmem:[#allocation8 + $0x28] sm:$0xff]   ;;  %v543_v17 = vld [vmem:[%s1065_s2] ss:$0 sm:$0xff] }
  0x5f   :  { %615 = vmatmul.mubr.msk.bf16.vlgmr.msra.gmra.mrb[0].mxu0 %vm124_vm1, %v689_v2  ;;  %v704_v27 = vld [vmem:[#allocation8 + $0x30] sm:$0xff]   ;;  %v705_v28 = vld [vmem:[#allocation8 + $0x38] sm:$0xff]   ;;  %v706_v29 = vld [vmem:[#allocation10] sm:$0xff]  }
  0x60   :  { %654 = vmatprep.mubr.msk.bf16.mxu0 %vm862_vm0, %v861_v0  ;;  %621 = vmatpush3.bf16.msra.mxu1 %v691_v4  ;;  %v707_v30 = vld [vmem:[#allocation10 + $0x8] sm:$0xff]   ;;  %v708_v31 = vld [vmem:[#allocation10 + $0x10] sm:$0xff]   ;;  %v709_v32 = vld [vmem:[#allocation10 + $0x18] sm:$0xff]  }
  0x61   :  { %622 = vmatprep.subr.bf16.mxu1 %v861_v0  ;;  %639 = vmatpush3.bf16.msra.mxu0 %v698_v11  ;;  %v710_v33 = vld [vmem:[#allocation10 + $0x20] sm:$0xff]   ;;  %v711_v34 = vld [vmem:[#allocation10 + $0x28] sm:$0xff]   ;;  %v547_v35 = vld [vmem:[%s1067_s4] ss:$0 sm:$0xff] }
  0x62   :  { %640 = vmatprep.subr.bf16.mxu0 %v861_v0  ;;  %v712_v45 = vld [vmem:[#allocation10 + $0x30] sm:$0xff]   ;;  %v713_v46 = vld [vmem:[#allocation10 + $0x38] sm:$0xff]  }
  0x63   :  { %v556_v47 = vld [vmem:[%s1069_s6] ss:$0 sm:$0xff]  ;;  %s824_s6 = scalar_lea.vmem %s530_s1, 128 }
  0x64   :  { %623 = vmatpush3.bf16.msra.mxu1 %v692_v5  ;;  %v565_v57 = vld [vmem:[%s1071_s8] ss:$0 sm:$0xff]  ;;  %p825_p12 = scmp.ne.s32.totalorder %s530_s1, %s824_s6  ;;  %p830_p0 = scmp.lt.s32.totalorder %s824_s6, %s824_s6 }
  0x65   :  { %624 = vmatprep.subr.bf16.mxu1 %v861_v0  ;;  %641 = vmatpush3.bf16.msra.mxu0 %v699_v12 }
  0x66   :  { %642 = vmatprep.subr.bf16.mxu0 %v861_v0  ;;  %p831_p1 = por %p830_p0, %p829_p13 }
  0x68   :  { %625 = vmatpush3.bf16.msra.mxu1 %v693_v6  ;;  %p832_p2 = pnand %p831_p1, %p825_p12 }
  0x69   :  { %626 = vmatprep.subr.bf16.mxu1 %v861_v0  ;;  %643 = vmatpush3.bf16.msra.mxu0 %v700_v13 }
  0x6a   :  { %644 = vmatprep.subr.bf16.mxu0 %v861_v0 }
  0x6c   :  { %627 = vmatpush3.bf16.msra.mxu1 %v694_v7 }
  0x6d   :  { %628 = vmatprep.subr.bf16.mxu1 %v861_v0  ;;  %645 = vmatpush3.bf16.msra.mxu0 %v701_v14 }
  0x6e   :  { %646 = vmatprep.subr.bf16.mxu0 %v861_v0 }
  0x70   :  { %629 = vmatpush3.bf16.msra.mxu1 %v695_v8 }
  0x71   :  { %630 = vmatprep.subr.bf16.mxu1 %v861_v0  ;;  %647 = vmatpush3.bf16.msra.mxu0 %v702_v15 }
  0x72   :  { %648 = vmatprep.subr.bf16.mxu0 %v861_v0 }
  0x74   :  { %631 = vmatpush3.bf16.msra.mxu1 %v696_v9 }
  0x75   :  { %632 = vmatprep.subr.bf16.mxu1 %v861_v0  ;;  %649 = vmatpush3.bf16.msra.mxu0 %v703_v16 }
  0x76   :  { %650 = vmatprep.subr.bf16.mxu0 %v861_v0 }
  0x78   :  { %633 = vmatpush3.bf16.msra.mxu1 %v697_v10 }
  0x79   :  { %658 = vmatprep.subr.bf16.mxu1 %v861_v0  ;;  %651 = vmatpush3.bf16.msra.mxu0 %v704_v27 }
  0x7a   :  { %652 = vmatprep.subr.bf16.mxu0 %v861_v0 }
  0x7d   :  { %653 = vmatpush3.bf16.msra.mxu0 %v705_v28 }
 0x132   :  { %v162_v18 = vpop.f32.mrb[0].mxu0 }
 0x133   :  { %v163_v19 = vadd.f32 %v543_v17, %v162_v18  ;;  %v616_v20 = vpop.f32.mrb[1].mxu0 }
 0x134   :  { %v165_v21 = vpop.f32.mrb[2].mxu0 }
 0x135   :  { %v166_v22 = vadd.f32 %v543_v17, %v165_v21  ;;  %v617_v23 = vpop.f32.mrb[3].mxu0  ;;  %v169_v24 = vmax.f32 %v163_v19, 0.0 }
 0x137   :  { %v170_v25 = vmax.f32 %v166_v22, 0.0 }
 0x139   :  { %v171_v26 = vpack.c.bf16 %v170_v25, %v169_v24 }
 0x13b   :  { %635 = vmatmul.mubr.bf16.vlgmr.msra.gmra.mrb[0].mxu1 %v171_v26 }
 0x13c   :  { %674 = vmatprep.mubr.msk.bf16.mxu1 %vm862_vm0, %v861_v0  ;;  %659 = vmatpush3.bf16.msra.mxu1 %v706_v29 }
 0x13d   :  { %660 = vmatprep.subr.bf16.mxu1 %v861_v0 }
 0x140   :  { %661 = vmatpush3.bf16.msra.mxu1 %v707_v30 }
 0x141   :  { %662 = vmatprep.subr.bf16.mxu1 %v861_v0 }
 0x144   :  { %663 = vmatpush3.bf16.msra.mxu1 %v708_v31 }
 0x145   :  { %664 = vmatprep.subr.bf16.mxu1 %v861_v0 }
 0x148   :  { %665 = vmatpush3.bf16.msra.mxu1 %v709_v32 }
 0x149   :  { %666 = vmatprep.subr.bf16.mxu1 %v861_v0 }
 0x14c   :  { %667 = vmatpush3.bf16.msra.mxu1 %v710_v33 }
 0x14d   :  { %668 = vmatprep.subr.bf16.mxu1 %v861_v0 }
 0x150   :  { %669 = vmatpush3.bf16.msra.mxu1 %v711_v34 }
 0x151   :  { %670 = vmatprep.subr.bf16.mxu1 %v861_v0 }
 0x154   :  { %671 = vmatpush3.bf16.msra.mxu1 %v712_v45 }
 0x155   :  { %672 = vmatprep.subr.bf16.mxu1 %v861_v0 }
 0x158   :  { %673 = vmatpush3.bf16.msra.mxu1 %v713_v46 }
 0x20e   :  { %v277_v36 = vpop.f32.mrb[0].mxu1 }
 0x20f   :  { %v278_v37 = vadd.f32 %v547_v35, %v277_v36  ;;  %v636_v38 = vpop.f32.mrb[1].mxu1 }
 0x210   :  { %v280_v39 = vpop.f32.mrb[2].mxu1 }
 0x211   :  { %v281_v40 = vadd.f32 %v547_v35, %v280_v39  ;;  %v637_v41 = vpop.f32.mrb[3].mxu1  ;;  %v284_v42 = vmax.f32 %v278_v37, 0.0 }
 0x213   :  { %v285_v43 = vmax.f32 %v281_v40, 0.0 }
 0x215   :  { %v286_v44 = vpack.c.bf16 %v285_v43, %v284_v42 }
 0x217   :  { %655 = vmatmul.mubr.bf16.vlgmr.msra.gmra.mrb[4].mxu0 %v286_v44 }
 0x2ea   :  { %v392_v48 = vpop.f32.mrb[4].mxu0 }
 0x2eb   :  { %v393_v49 = vadd.f32 %v556_v47, %v392_v48  ;;  %v656_v50 = vpop.f32.mrb[5].mxu0 }
 0x2ec   :  { %v395_v51 = vpop.f32.mrb[6].mxu0 }
 0x2ed   :  { %v396_v52 = vadd.f32 %v556_v47, %v395_v51  ;;  %v657_v53 = vpop.f32.mrb[7].mxu0  ;;  %v399_v54 = vmax.f32 %v393_v49, 0.0 }
 0x2ef   :  { %v400_v55 = vmax.f32 %v396_v52, 0.0 }
 0x2f1   :  { %v401_v56 = vpack.c.bf16 %v400_v55, %v399_v54 }
 0x2f3   :  { %675 = vmatmul.mubr.bf16.vlgmr.msra.gmra.mrb[4].mxu1 %v401_v56 }
 0x3c6   :  { %v507_v58 = vpop.f32.mrb[4].mxu1 }
 0x3c7   :  { %v676_v59 = vpop.f32.mrb[5].mxu1  ;;  %v508_v61 = vadd.f32 %v565_v57, %v507_v58 }
 0x3c8   :  { %v510_v60 = vpop.f32.mrb[6].mxu1 }
 0x3c9   :  { %v511_v62 = vadd.f32 %v565_v57, %v510_v60  ;;  %v677_v63 = vpop.f32.mrb[7].mxu1 }
 0x3cb   :  { %v581_v0 = vpack.c.bf16 %v511_v62, %v508_v61 }
 0x3cd   :  { %582 = vst [vmem:[#allocation11] sm:$0xff] %v581_v0  }
 0x3ce   :  { %835 = shalt.err (!%p832_p2)
}
 0x3cf   :  { %s836_s14 = scalar_lea.hbm %s1072_s9, 128 }
 0x3d0   :  { %p837_p3 = scmp.ne.s32.totalorder %s1072_s9, %s836_s14  ;;  %p840_p4 = scmp.lt.u32.totalorder %s836_s14, %s1072_s9 }
 0x3d2   :  { %p842_p5 = pnand %p840_p4, %p837_p3 }
 0x3d4   :  { %845 = shalt.err (!%p842_p5)
}
 0x3d5   :  { %535 = dma.vmem_to_hbm [thread:$0]  %s530_s1, 128, %s1072_s9, [#allocation4], %s856_s21, %s856_s21, %s857_s22  }
 0x3d6   :  { %852 = dma.done.wait [#allocation4], 128  }
 0x3d7   :  { %853 = vsyncadd [#allocation4], 4294967168 }
 0x3d8   :  { %539 = vsyncpa [#allocation3], 1 }
 0x3d9   :  { %540 = vsyncpa [#allocation6], 1 }
 0x3da   :  { %541 = vsyncpa [#allocation9], 1 }
 0x3db   :  { %542 = vsyncpa [#allocation4], 1 }

</bundles_post_ra>
